<compile_context>
chip_gen: v7x
topology: tpu7x:2x2x1
jax: 0.10.0
libtpu: 0.0.40
codegen_flags: <defaults>
</compile_context>

<pallas_src>
import functools

import jax
import jax.numpy as jnp
from jax import lax
from jax.experimental import pallas as pl
from jax.experimental.pallas import tpu as pltpu


def make_divisible(v, divisor=8, min_value=1):
    if min_value is None:
        min_value = divisor
    new_v = max(min_value, int(v + divisor / 2) // divisor * divisor)
    if new_v < 0.9 * v:
        new_v += divisor
    return new_v


def _round_up(x, m):
    return ((x + m - 1) // m) * m


def _pad2(a, rows, cols):
    return jnp.pad(a, ((0, rows - a.shape[0]), (0, cols - a.shape[1])))


def _vmem_limit(block_bytes):
    # Explicit scoped-VMEM cap: ~2x the block working set + headroom, clamped to
    # [32 MiB, 60 MiB] (>= v5e/v6e defaults, below v7x's 64 MiB physical VMEM).
    return int(min(max(2 * block_bytes + (2 << 20), 32 << 20), 60 << 20))


# -----------------------------------------------------------------------------
# Kernel 1: pointwise (1x1) conv as tiled matmul + folded-BN shift
#           (+ optional ReLU6, + optional residual add)
# -----------------------------------------------------------------------------
def _pw_epilogue(acc_ref, shift_ref, o_ref, res_ref, relu6):
    y = acc_ref[...] + shift_ref[...]
    if relu6:
        y = jnp.minimum(jnp.maximum(y, 0.0), 6.0)
    if res_ref is not None:
        y = y + res_ref[...].astype(jnp.float32)
    o_ref[...] = y.astype(o_ref.dtype)


def _pw_kernel(x_ref, w_ref, shift_ref, o_ref, acc_ref, *, relu6):
    k = pl.program_id(2)

    @pl.when(k == 0)
    def _():
        acc_ref[...] = jnp.zeros_like(acc_ref)

    acc_ref[...] += jnp.dot(x_ref[...], w_ref[...],
                            preferred_element_type=jnp.float32)

    @pl.when(k == pl.num_programs(2) - 1)
    def _():
        _pw_epilogue(acc_ref, shift_ref, o_ref, None, relu6)


def _pw_res_kernel(x_ref, w_ref, shift_ref, res_ref, o_ref, acc_ref, *, relu6):
    k = pl.program_id(2)

    @pl.when(k == 0)
    def _():
        acc_ref[...] = jnp.zeros_like(acc_ref)

    acc_ref[...] += jnp.dot(x_ref[...], w_ref[...],
                            preferred_element_type=jnp.float32)

    @pl.when(k == pl.num_programs(2) - 1)
    def _():
        _pw_epilogue(acc_ref, shift_ref, o_ref, res_ref, relu6)


def pointwise_conv_bn(x_flat, w_mat, scale, shift, *, relu6, residual=None,
                      matmul_dtype=jnp.bfloat16, out_dtype=jnp.float32):
    """y = [relu6]( x_flat @ (w_mat * scale) + shift ) [+ residual]

    x_flat: (M, K) NHWC activations flattened over batch*spatial.
    w_mat : (K, N) 1x1 conv weight; scale/shift: (N,) folded BN affine.
    Returns (M, Np) with Np = round_up(N, 128); padded out-channels are zero.
    """
    M, K = x_flat.shape
    N = w_mat.shape[1]
    # fold BN scale into the conv weights on the host (f32, then cast once)
    w_mat = w_mat.astype(jnp.float32) * scale.astype(jnp.float32)[None, :]

    # lane/sublane-dense padding + tile selection
    Kp = _round_up(K, 128)                     # at most +127 padded K
    if Kp <= 1024:
        tk = Kp                                # single K step
    else:
        tk = max(t for t in (512, 256, 128) if Kp % t == 0)
    Np = _round_up(N, 128)
    tn = 256 if Np % 256 == 0 else 128         # use both 256-wide MXU halves
    itemsize = jnp.dtype(matmul_dtype).itemsize
    tm_cap = 512 if itemsize <= 2 else 256
    tm = min(tm_cap, _round_up(M, 8))
    Mp = _round_up(M, tm)

    xp = _pad2(x_flat, Mp, Kp)
    if xp.dtype != matmul_dtype:               # no-op when producer already bf16
        xp = xp.astype(matmul_dtype)
    wp = _pad2(w_mat, Kp, Np).astype(matmul_dtype)
    shiftp = _pad2(shift.reshape(1, N).astype(jnp.float32), 1, Np)

    in_specs = [
        pl.BlockSpec((tm, tk), lambda i, j, k: (i, k)),
        pl.BlockSpec((tk, tn), lambda i, j, k: (k, j)),
        pl.BlockSpec((1, tn), lambda i, j, k: (0, j)),
    ]
    args = [xp, wp, shiftp]
    res_bytes = 0
    if residual is not None:
        # keep the residual in the (narrow) network dtype; up-cast in-kernel
        resp = _pad2(residual, Mp, Np).astype(matmul_dtype)
        in_specs.append(pl.BlockSpec((tm, tn), lambda i, j, k: (i, j)))
        args.append(resp)
        kernel = functools.partial(_pw_res_kernel, relu6=relu6)
        res_bytes = Mp * Np * itemsize
    else:
        kernel = functools.partial(_pw_kernel, relu6=relu6)

    out_itemsize = jnp.dtype(out_dtype).itemsize
    block_bytes = ((tm * tk + tk * tn) * itemsize + tm * tn * out_itemsize
                   + tn * 4 + tm * tn * 4
                   + (tm * tn * itemsize if residual is not None else 0))

    out = pl.pallas_call(
        kernel,
        out_shape=jax.ShapeDtypeStruct((Mp, Np), out_dtype),
        grid_spec=pltpu.PrefetchScalarGridSpec(
            num_scalar_prefetch=0,
            grid=(Mp // tm, Np // tn, Kp // tk),
            in_specs=in_specs,
            out_specs=pl.BlockSpec((tm, tn), lambda i, j, k: (i, j)),
            scratch_shapes=[pltpu.VMEM((tm, tn), jnp.float32)],
        ),
        compiler_params=pltpu.CompilerParams(
            dimension_semantics=("parallel", "parallel", "arbitrary"),
            vmem_limit_bytes=_vmem_limit(block_bytes)),
        cost_estimate=pl.CostEstimate(
            flops=2 * Mp * Kp * Np,
            transcendentals=0,
            bytes_accessed=(Mp * Kp + Kp * Np) * itemsize + res_bytes
            + Mp * Np * out_itemsize),
    )(*args)
    return out[:M]


# -----------------------------------------------------------------------------
# Kernel 2: 3x3 depthwise conv (pad=1) + folded-BN shift + ReLU6
# -----------------------------------------------------------------------------
def _dw_s1_kernel(x_ref, w_ref, shift_ref, o_ref):
    """Stride-1 3x3 depthwise.  Halo handled fully in-kernel: column (W) shifts
    via XLU pltpu.roll + edge masks, row (H) shifts via major-axis concats, so
    there are no sublane-unaligned slices."""
    _, H, W, tc = x_ref.shape
    xf = x_ref[0].astype(jnp.float32)                                 # (H, W, tc)
    wi = lax.broadcasted_iota(jnp.int32, (H, W, tc), 1)
    x_m1 = jnp.where(wi >= 1, pltpu.roll(xf, shift=1, axis=1), 0.0)       # x[:, w-1]
    x_p1 = jnp.where(wi <= W - 2, pltpu.roll(xf, shift=W - 1, axis=1), 0.0)  # x[:, w+1]
    xs = (x_m1, xf, x_p1)

    def wv(kh, kw):                                                    # (1, 1, tc)
        return w_ref[kh:kh + 1, kw:kw + 1, :].astype(jnp.float32)

    # t[kh][h_in] = sum_kw x[h_in, .+kw-1] * w[kh, kw]
    t = [xs[0] * wv(kh, 0) + xs[1] * wv(kh, 1) + xs[2] * wv(kh, 2)
         for kh in range(3)]
    zrow = jnp.zeros((1, W, tc), jnp.float32)
    y = (jnp.concatenate([zrow, t[0][:H - 1]], axis=0)    # contribution of row h-1
         + t[1]                                           # contribution of row h
         + jnp.concatenate([t[2][1:], zrow], axis=0))     # contribution of row h+1
    y = jnp.minimum(jnp.maximum(y + shift_ref[...], 0.0), 6.0)
    o_ref[0] = y.astype(o_ref.dtype)


def _dw_s2_kernel(x_ref, w_ref, shift_ref, o_ref):
    """Stride-2 3x3 depthwise on a stride-phase-decomposed input block."""
    _, Ho, Wo, tc = o_ref.shape
    acc = jnp.zeros((Ho, Wo, tc), jnp.float32)
    for kh in range(3):
        for kw in range(3):
            p = (kh % 2) * 2 + (kw % 2)                   # stride phase
            rs, cs = kh // 2, kw // 2                     # offset within phase
            tap = x_ref[0, p, rs:rs + Ho, cs:cs + Wo, :].astype(jnp.float32)
            acc = acc + tap * w_ref[kh:kh + 1, kw:kw + 1, :].astype(jnp.float32)
    y = jnp.minimum(jnp.maximum(acc + shift_ref[...], 0.0), 6.0)
    o_ref[0] = y.astype(o_ref.dtype)


def depthwise_conv_bn_relu6(x_nhwc, w_dw, scale, shift, *, stride,
                            out_dtype=jnp.bfloat16):
    """x_nhwc: (B,H,W,Cp) with Cp a multiple of 128; w_dw: (3,3,C) HWC weights."""
    B, H, W, Cp = x_nhwc.shape
    C = w_dw.shape[-1]
    s = stride
    Ho = (H + 2 - 3) // s + 1
    Wo = (W + 2 - 3) // s + 1

    w = jnp.pad(w_dw.astype(jnp.float32) * scale.astype(jnp.float32)[None, None, :],
                ((0, 0), (0, 0), (0, Cp - C)))
    shiftp = jnp.pad(shift.reshape(1, C).astype(jnp.float32), ((0, 0), (0, Cp - C)))

    tc = 128                                   # lane-dense channel tile
    in_itemsize = jnp.dtype(x_nhwc.dtype).itemsize
    out_itemsize = jnp.dtype(out_dtype).itemsize
    # TODO(synk): add output-row-band tiling (with in-kernel halo) so per-step
    # temporaries stay well inside v7x's 64 MiB VMEM for very large spatial dims.

    if s == 1:
        block_bytes = (H * W * tc * (in_itemsize + out_itemsize)
                       + 8 * H * W * tc * 4)
        return pl.pallas_call(
            _dw_s1_kernel,
            out_shape=jax.ShapeDtypeStruct((B, Ho, Wo, Cp), out_dtype),
            grid_spec=pltpu.PrefetchScalarGridSpec(
                num_scalar_prefetch=0,
                grid=(B, Cp // tc),
                in_specs=[
                    pl.BlockSpec((1, H, W, tc), lambda b, c: (b, 0, 0, c)),
                    pl.BlockSpec((3, 3, tc), lambda b, c: (0, 0, c)),
                    pl.BlockSpec((1, tc), lambda b, c: (0, c)),
                ],
                out_specs=pl.BlockSpec((1, Ho, Wo, tc), lambda b, c: (b, 0, 0, c)),
            ),
            compiler_params=pltpu.CompilerParams(
                dimension_semantics=("parallel", "parallel"),
                vmem_limit_bytes=_vmem_limit(block_bytes)),
            cost_estimate=pl.CostEstimate(
                flops=2 * 9 * B * Ho * Wo * Cp, transcendentals=0,
                bytes_accessed=B * Cp * (H * W * in_itemsize
                                         + Ho * Wo * out_itemsize)),
        )(x_nhwc, w, shiftp)

    # ---- stride == 2: host-side stride-phase decomposition (strided taps
    # become contiguous in-kernel slices). ----
    assert s == 2
    assert H % 2 == 0 and W % 2 == 0, "stride-2 path assumes even H, W"
    # TODO(synk): move the phase split into the index_map / in-kernel DMA to
    # drop this extra HBM pass over the hidden tensor.
    xpad = jnp.pad(x_nhwc, ((0, 0), (1, 1), (1, 1), (0, 0)))
    phases = [xpad[:, p::s, q::s, :] for p in range(s) for q in range(s)]
    Hpp, Wpp = phases[0].shape[1], phases[0].shape[2]
    xph = jnp.stack(phases, axis=1)            # (B, 4, Hpp, Wpp, Cp)

    block_bytes = (4 * Hpp * Wpp * tc * in_itemsize
                   + Ho * Wo * tc * (out_itemsize + 8))
    return pl.pallas_call(
        _dw_s2_kernel,
        out_shape=jax.ShapeDtypeStruct((B, Ho, Wo, Cp), out_dtype),
        grid_spec=pltpu.PrefetchScalarGridSpec(
            num_scalar_prefetch=0,
            grid=(B, Cp // tc),
            in_specs=[
                pl.BlockSpec((1, 4, Hpp, Wpp, tc), lambda b, c: (b, 0, 0, 0, c)),
                pl.BlockSpec((3, 3, tc), lambda b, c: (0, 0, c)),
                pl.BlockSpec((1, tc), lambda b, c: (0, c)),
            ],
            out_specs=pl.BlockSpec((1, Ho, Wo, tc), lambda b, c: (b, 0, 0, c)),
        ),
        compiler_params=pltpu.CompilerParams(
            dimension_semantics=("parallel", "parallel"),
            vmem_limit_bytes=_vmem_limit(block_bytes)),
        cost_estimate=pl.CostEstimate(
            flops=2 * 9 * B * Ho * Wo * Cp, transcendentals=0,
            bytes_accessed=B * Cp * (4 * Hpp * Wpp * in_itemsize
                                     + Ho * Wo * out_itemsize)),
    )(xph, w, shiftp)


# -----------------------------------------------------------------------------
# Module wrapper (eval mode, width_mult = 1.0)
# -----------------------------------------------------------------------------
class USInvertedResidualPallas:
    def __init__(self, inp, oup, stride, expand_ratio, eps=1e-5,
                 key=None, matmul_dtype=jnp.bfloat16):
        assert stride in (1, 2)
        self.inp, self.oup, self.stride = inp, oup, stride
        self.expand_ratio = expand_ratio
        self.hidden = int(round(inp * expand_ratio))
        self.use_res_connect = (stride == 1 and inp == oup)
        self.eps = eps
        self.matmul_dtype = matmul_dtype   # bf16 operands; accumulation stays f32
        # At width_mult=1.0 the US slicing selects the full weights, so no
        # slicing is needed here.
        # TODO(synk): arbitrary slimmable width_mult (channel-sliced weights/BN stats).

        if key is None:
            key = jax.random.PRNGKey(0)
        ks = jax.random.split(key, 6)

        def bn_params(c, k0, k1, k2, k3):
            return dict(
                gamma=1.0 + 0.1 * jax.random.normal(k0, (c,), jnp.float32),
                beta=0.1 * jax.random.normal(k1, (c,), jnp.float32),
                mean=0.05 * jax.random.normal(k2, (c,), jnp.float32),
                var=1.0 + 0.1 * jax.random.uniform(k3, (c,), jnp.float32))

        hid = self.hidden
        if expand_ratio != 1:
            self.w_expand = 0.2 * jax.random.normal(ks[0], (hid, inp, 1, 1), jnp.float32)
            self.bn1 = bn_params(hid, *jax.random.split(ks[1], 4))
        self.w_dw = 0.2 * jax.random.normal(ks[2], (hid, 1, 3, 3), jnp.float32)
        self.bn2 = bn_params(hid, *jax.random.split(ks[3], 4))
        self.w_proj = 0.2 * jax.random.normal(ks[4], (oup, hid, 1, 1), jnp.float32)
        self.bn3 = bn_params(oup, *jax.random.split(ks[5], 4))

    def _fold(self, bn):
        scale = bn["gamma"] / jnp.sqrt(bn["var"] + self.eps)
        shift = bn["beta"] - bn["mean"] * scale
        return scale, shift

    def __call__(self, x_nchw):
        B, C, H, W = x_nchw.shape
        assert C == self.inp
        x_nhwc = jnp.transpose(x_nchw, (0, 2, 3, 1))
        mmdt = self.matmul_dtype

        # ---- expand: 1x1 conv + BN + ReLU6 (Pallas MXU kernel, bf16 hidden) ----
        if self.expand_ratio != 1:
            scale1, shift1 = self._fold(self.bn1)
            w1 = self.w_expand.reshape(self.hidden, self.inp).T        # (Cin, hid)
            h_flat = pointwise_conv_bn(
                x_nhwc.reshape(B * H * W, self.inp), w1, scale1, shift1,
                relu6=True, matmul_dtype=mmdt, out_dtype=mmdt)         # (M, Cp) bf16
            Cp = h_flat.shape[1]
            h = h_flat.reshape(B, H, W, Cp)
        else:
            Cp = _round_up(self.hidden, 128)
            h = jnp.pad(x_nhwc, ((0, 0), (0, 0), (0, 0),
                                 (0, Cp - self.hidden))).astype(mmdt)

        # ---- depthwise 3x3 + BN + ReLU6 (Pallas VPU/XLU kernel) ----
        scale2, shift2 = self._fold(self.bn2)
        w_dw_hwc = jnp.transpose(self.w_dw[:, 0], (1, 2, 0))           # (3,3,hid)
        h = depthwise_conv_bn_relu6(h, w_dw_hwc, scale2, shift2,
                                    stride=self.stride, out_dtype=mmdt)
        _, Ho, Wo, _ = h.shape

        # ---- project: 1x1 conv + BN (+ residual) (Pallas MXU kernel, f32 out) ----
        scale3, shift3 = self._fold(self.bn3)
        w3 = self.w_proj.reshape(self.oup, self.hidden).T              # (hid, oup)
        w3 = jnp.pad(w3, ((0, Cp - self.hidden), (0, 0)))              # match padded K
        residual = (x_nhwc.reshape(B * Ho * Wo, self.oup)
                    if self.use_res_connect else None)
        out_flat = pointwise_conv_bn(
            h.reshape(B * Ho * Wo, Cp), w3, scale3, shift3,
            relu6=False, residual=residual,
            matmul_dtype=mmdt, out_dtype=jnp.float32)
        out = out_flat[:, :self.oup].reshape(B, Ho, Wo, self.oup)
        return jnp.transpose(out, (0, 3, 1, 2))                        # NCHW
        # TODO(synk): fuse expand->dw->project over spatial row bands inside one
        # kernel (weights resident in VMEM) to cut hidden-tensor HBM traffic ~4x.


# -----------------------------------------------------------------------------
# Pure-JAX reference (XLA conv + BN + ReLU6, f32) for correctness check
# -----------------------------------------------------------------------------
def reference_forward(m, x):
    def bn(h, p):
        inv = 1.0 / jnp.sqrt(p["var"] + m.eps)
        return ((h - p["mean"][None, :, None, None]) * inv[None, :, None, None]
                * p["gamma"][None, :, None, None] + p["beta"][None, :, None, None])

    h = x
    if m.expand_ratio != 1:
        h = lax.conv_general_dilated(h, m.w_expand, (1, 1), ((0, 0), (0, 0)),
                                     dimension_numbers=("NCHW", "OIHW", "NCHW"))
        h = jnp.clip(bn(h, m.bn1), 0.0, 6.0)
    h = lax.conv_general_dilated(h, m.w_dw, (m.stride, m.stride), ((1, 1), (1, 1)),
                                 dimension_numbers=("NCHW", "OIHW", "NCHW"),
                                 feature_group_count=m.hidden)
    h = jnp.clip(bn(h, m.bn2), 0.0, 6.0)
    h = lax.conv_general_dilated(h, m.w_proj, (1, 1), ((0, 0), (0, 0)),
                                 dimension_numbers=("NCHW", "OIHW", "NCHW"))
    h = bn(h, m.bn3)
    if m.use_res_connect:
        h = x + h
    return h


if __name__ == "__main__":
    root = jax.random.PRNGKey(0)
    kx, kp1, kp2 = jax.random.split(root, 3)

    B, Cin, H, W = 2, 4, 16, 16
    x = jax.random.normal(kx, (B, Cin, H, W), dtype=jnp.float32)

    # Case 1: expand_ratio=6, stride=1, inp==oup -> expand + dw + project + residual
    blk1 = USInvertedResidualPallas(inp=4, oup=4, stride=1, expand_ratio=6, key=kp1)
    out1 = jax.block_until_ready(blk1(x))
    ref1 = reference_forward(blk1, x)
    assert out1.shape == (B, 4, H, W)
    # bf16 operands / bf16 hidden activations -> looser tolerance than pure f32
    assert jnp.allclose(out1, ref1, atol=5e-2, rtol=5e-2), \
        float(jnp.max(jnp.abs(out1 - ref1)))

    # Case 2: expand_ratio=1, stride=2 -> dw + project only, no residual
    blk2 = USInvertedResidualPallas(inp=4, oup=8, stride=2, expand_ratio=1, key=kp2)
    out2 = jax.block_until_ready(blk2(x))
    ref2 = reference_forward(blk2, x)
    assert out2.shape == (B, 8, H // 2, W // 2)
    assert jnp.allclose(out2, ref2, atol=5e-2, rtol=5e-2), \
        float(jnp.max(jnp.abs(out2 - ref2)))

    print("KERNEL_OK")
</pallas_src>

<mosaic_0001>
module attributes {stable_mosaic.version = 11 : i64} {
  func.func @_pw_kernel(%arg0: i32, %arg1: i32, %arg2: i32, %arg3: memref<512x128xbf16, #tpu.memory_space<vmem>>, %arg4: memref<128x128xbf16, #tpu.memory_space<vmem>>, %arg5: memref<1x128xf32, #tpu.memory_space<vmem>>, %arg6: memref<512x128xbf16, #tpu.memory_space<vmem>>, %arg7: memref<512x128xf32, #tpu.memory_space<vmem>>) attributes {dimension_semantics = [#tpu.dimension_semantics<parallel>, #tpu.dimension_semantics<parallel>, #tpu.dimension_semantics<arbitrary>], iteration_bounds = array<i64: 1, 1, 1>, scalar_prefetch = 0 : i64, scratch_operands = 1 : i64, tpu.core_type = #tpu.core_type<tc>, window_params = [{transform_indices = @transform_0, window_bounds = array<i64: 512, 128>}, {transform_indices = @transform_1, window_bounds = array<i64: 128, 128>}, {transform_indices = @transform_2, window_bounds = array<i64: 1, 128>}, {transform_indices = @transform_3, window_bounds = array<i64: 512, 128>}]} {
    %c0_i32 = arith.constant 0 : i32
    %0 = arith.cmpi eq, %arg2, %c0_i32 : i32
    %1 = arith.extui %0 : i1 to i32
    %c0_i32_0 = arith.constant 0 : i32
    %2 = arith.cmpi ne, %1, %c0_i32_0 : i32
    scf.if %2 {
      %cst_10 = arith.constant 0.000000e+00 : f32
      %12 = vector.broadcast %cst_10 : f32 to vector<512x128xf32>
      %c0_11 = arith.constant 0 : index
      %c0_12 = arith.constant 0 : index
      %13 = vector.load %arg7[%c0_11, %c0_12] : memref<512x128xf32, #tpu.memory_space<vmem>>, vector<512x128xf32>
      tpu.vector_store %arg7[%c0_11, %c0_12], %12 {strides = array<i32>} : memref<512x128xf32, #tpu.memory_space<vmem>>, vector<512x128xf32>,
    } else {
    }
    %c0 = arith.constant 0 : index
    %c0_1 = arith.constant 0 : index
    %3 = vector.load %arg7[%c0, %c0_1] : memref<512x128xf32, #tpu.memory_space<vmem>>, vector<512x128xf32>
    %c0_2 = arith.constant 0 : index
    %c0_3 = arith.constant 0 : index
    %4 = vector.load %arg3[%c0_2, %c0_3] : memref<512x128xbf16, #tpu.memory_space<vmem>>, vector<512x128xbf16>
    %c0_4 = arith.constant 0 : index
    %c0_5 = arith.constant 0 : index
    %5 = vector.load %arg4[%c0_4, %c0_5] : memref<128x128xbf16, #tpu.memory_space<vmem>>, vector<128x128xbf16>
    %cst = arith.constant dense<0.000000e+00> : vector<512x128xf32>
    %6 = tpu.matmul %4, %5, %cst {dimension_numbers = #tpu.dot_dimension_numbers<[1], [0], [0], [1], [0, 0, 1, 1], [], []>} : vector<512x128xbf16>, vector<128x128xbf16>, vector<512x128xf32> -> vector<512x128xf32>
    %7 = arith.addf %3, %6 : vector<512x128xf32>
    %c0_6 = arith.constant 0 : index
    %c0_7 = arith.constant 0 : index
    %8 = vector.load %arg7[%c0_6, %c0_7] : memref<512x128xf32, #tpu.memory_space<vmem>>, vector<512x128xf32>
    tpu.vector_store %arg7[%c0_6, %c0_7], %7 {strides = array<i32>} : memref<512x128xf32, #tpu.memory_space<vmem>>, vector<512x128xf32>,
    %c0_i32_8 = arith.constant 0 : i32
    %9 = arith.cmpi eq, %arg2, %c0_i32_8 : i32
    %10 = arith.extui %9 : i1 to i32
    %c0_i32_9 = arith.constant 0 : i32
    %11 = arith.cmpi ne, %10, %c0_i32_9 : i32
    scf.if %11 {
      %c0_10 = arith.constant 0 : index
      %c0_11 = arith.constant 0 : index
      %12 = vector.load %arg7[%c0_10, %c0_11] : memref<512x128xf32, #tpu.memory_space<vmem>>, vector<512x128xf32>
      %c0_12 = arith.constant 0 : index
      %c0_13 = arith.constant 0 : index
      %13 = vector.load %arg5[%c0_12, %c0_13] : memref<1x128xf32, #tpu.memory_space<vmem>>, vector<1x128xf32>
      %14 = vector.broadcast %13 : vector<1x128xf32> to vector<512x128xf32>
      %15 = arith.addf %12, %14 : vector<512x128xf32>
      %cst_14 = arith.constant 0.000000e+00 : f32
      %16 = vector.broadcast %cst_14 : f32 to vector<512x128xf32>
      %17 = arith.maximumf %15, %16 : vector<512x128xf32>
      %cst_15 = arith.constant 6.000000e+00 : f32
      %18 = vector.broadcast %cst_15 : f32 to vector<512x128xf32>
      %19 = arith.minimumf %17, %18 : vector<512x128xf32>
      %20 = arith.truncf %19 : vector<512x128xf32> to vector<512x128xbf16>
      %c0_16 = arith.constant 0 : index
      %c0_17 = arith.constant 0 : index
      %21 = vector.load %arg6[%c0_16, %c0_17] : memref<512x128xbf16, #tpu.memory_space<vmem>>, vector<512x128xbf16>
      tpu.vector_store %arg6[%c0_16, %c0_17], %20 {strides = array<i32>} : memref<512x128xbf16, #tpu.memory_space<vmem>>, vector<512x128xbf16>,
    } else {
    }
    return
  }
  func.func @transform_0(%arg0: i32, %arg1: i32, %arg2: i32) -> (i32, i32) {
    %c0_i32 = arith.constant 0 : i32
    return %arg0, %arg2 : i32, i32
  }
  func.func @transform_1(%arg0: i32, %arg1: i32, %arg2: i32) -> (i32, i32) {
    %c0_i32 = arith.constant 0 : i32
    return %arg2, %arg1 : i32, i32
  }
  func.func @transform_2(%arg0: i32, %arg1: i32, %arg2: i32) -> (i32, i32) {
    %c0_i32 = arith.constant 0 : i32
    %c0_i32_0 = arith.constant 0 : i32
    return %c0_i32, %arg1 : i32, i32
  }
  func.func @transform_3(%arg0: i32, %arg1: i32, %arg2: i32) -> (i32, i32) {
    %c0_i32 = arith.constant 0 : i32
    return %arg0, %arg1 : i32, i32
  }
}

</mosaic_0001>

<bundles_post_ra>
// kernel: tpu_custom_call.1
= control target key start
LH: loop header
LB: loop body
LE: loop exit
PB: predicated region body
PF: predicated region fallthrough
CT: control target
= control target key end

     0   :  { %8 = vsyncpa [#allocation4], 0  ;;  %s2269_s0 = inlined_call_operand.hbm [shape: bf16[512,128], index: 0, kind: input, shape index: {}]   ;;  %s2270_s1 = inlined_call_operand.hbm [shape: bf16[128,128], index: 1, kind: input, shape index: {}]   ;;  %s2271_s2 = inlined_call_operand.vmem [shape: f32[1,128], index: 2, kind: input, shape index: {}]   ;;  %s2272_s3 = inlined_call_operand.hbm [shape: bf16[512,128], index: 3, kind: output, shape index: {}]  }
   0x1   :  { %9 = vsyncpa [#allocation7], 0 }
   0x2   :  { %10 = vsyncpa [#allocation5], 0  ;;  %s2130_s12 = smov [#allocation3]   ;;  %s2058_s16 = scalar_lea.hbm %s2269_s0, 4096 }
   0x3   :  { %s16_s13 = sshll.u32 %s2130_s12, 4  ;;  %p2059_p0 = scmp.ne.s32.totalorder %s2269_s0, %s2058_s16  ;;  %s17_s13 = int_to_ptr.vmem [resolvable:$true] %s16_s13 }
   0x4   :  { %p2062_p1 = scmp.lt.u32.totalorder %s2058_s16, %s2269_s0 }
   0x6   :  { %p2064_p2 = pnand %p2062_p1, %p2059_p0 }
   0x8   :  { %2067 = shalt.err (!%p2064_p2)
}
   0x9   :  { %s2068_s21 = scalar_lea.vmem %s17_s13, 4096  ;;  %p2073_p4 = scmp.lt.s32.totalorder %s17_s13, %s17_s13 }
   0xa   :  { %p2069_p3 = scmp.ne.s32.totalorder %s17_s13, %s2068_s21  ;;  %p2074_p5 = scmp.lt.s32.totalorder %s2068_s21, %s2068_s21 }
   0xc   :  { %p2075_p6 = por %p2074_p5, %p2073_p4 }
   0xe   :  { %p2076_p7 = pnand %p2075_p6, %p2069_p3 }
  0x10   :  { %2079 = shalt.err (!%p2076_p7)
}
  0x11   :  { %s2131_s22 = smov 64   ;;  %s2132_s23 = smov 4  }
  0x12   :  { %22 = dma.hbm_to_vmem [thread:$0]  %s2269_s0, 4096, %s17_s13, [#allocation4], %s2131_s22, %s2131_s22, %s2132_s23  }
  0x13   :  { %s2133_s26 = smov [#allocation6]   ;;  %s2080_s30 = scalar_lea.hbm %s2270_s1, 1024 }
  0x14   :  { %s28_s27 = sshll.u32 %s2133_s26, 4  ;;  %p2081_p8 = scmp.ne.s32.totalorder %s2270_s1, %s2080_s30  ;;  %s29_s27 = int_to_ptr.vmem [resolvable:$true] %s28_s27 }
  0x15   :  { %p2084_p9 = scmp.lt.u32.totalorder %s2080_s30, %s2270_s1 }
  0x17   :  { %p2086_p10 = pnand %p2084_p9, %p2081_p8 }
  0x19   :  { %2089 = shalt.err (!%p2086_p10)
}
  0x1a   :  { %s2090_s8 = scalar_lea.vmem %s29_s27, 1024  ;;  %p2095_p12 = scmp.lt.s32.totalorder %s29_s27, %s29_s27 }
  0x1b   :  { %p2091_p11 = scmp.ne.s32.totalorder %s29_s27, %s2090_s8  ;;  %p2096_p13 = scmp.lt.s32.totalorder %s2090_s8, %s2090_s8 }
  0x1d   :  { %p2097_p0 = por %p2096_p13, %p2095_p12 }
  0x1f   :  { %p2098_p1 = pnand %p2097_p0, %p2091_p11 }
  0x21   :  { %2101 = shalt.err (!%p2098_p1)
}
  0x22   :  { %34 = dma.hbm_to_vmem [thread:$0]  %s2270_s1, 1024, %s29_s27, [#allocation7], %s2131_s22, %s2131_s22, %s2132_s23  }
  0x23   :  { %2124 = dma.done.wait [#allocation4], 4096  }
  0x24   :  { %2125 = vsyncadd [#allocation4], 4294963200 }
  0x25   :  { %2126 = dma.done.wait [#allocation7], 1024  }
  0x26   :  { %2127 = vsyncadd [#allocation7], 4294966272  ;;  %v2018_v0 = vld [vmem:[#allocation6] sm:$0xff]   ;;  %v2019_v1 = vld [vmem:[#allocation6 + $0x8] sm:$0xff]  }
  0x27   :  { %1917 = vmatprep.subr.bf16.mxu0 %v2018_v0  ;;  %1997 = vmatprep.subr.bf16.mxu1 %v2018_v0  ;;  %v2020_v2 = vld [vmem:[#allocation6 + $0x10] sm:$0xff]   ;;  %v2021_v3 = vld [vmem:[#allocation6 + $0x18] sm:$0xff]   ;;  %v2026_v4 = vld [vmem:[#allocation3] sm:$0xff]  }
  0x28   :  { %1918 = vmatpush3.bf16.msra.mxu0 %v2018_v0  ;;  %2005 = vmatpush3.bf16.msra.mxu1 %v2018_v0  ;;  %v2027_v5 = vld [vmem:[#allocation3 + $0x80] sm:$0xff]   ;;  %v2023_v7 = vld [vmem:[#allocation6 + $0x28] sm:$0xff]   ;;  %v2024_v8 = vld [vmem:[#allocation6 + $0x30] sm:$0xff]  }
  0x29   :  { %1919 = vmatprep.subr.bf16.mxu0 %v2019_v1  ;;  %1998 = vmatprep.subr.bf16.mxu1 %v2019_v1  ;;  %v2022_v6 = vld [vmem:[#allocation6 + $0x20] sm:$0xff]   ;;  %v2025_v9 = vld [vmem:[#allocation6 + $0x38] sm:$0xff]   ;;  %v2028_v10 = vld [vmem:[#allocation3 + $0x8] sm:$0xff]  }
  0x2a   :  { %1933 = vmatprep.mubr.bf16.mxu0 %v2026_v4  ;;  %1965 = vmatprep.mubr.bf16.mxu1 %v2027_v5  ;;  %v2029_v11 = vld [vmem:[#allocation3 + $0x88] sm:$0xff]   ;;  %v2030_v12 = vld [vmem:[#allocation3 + $0x10] sm:$0xff]   ;;  %v2032_v14 = vld [vmem:[#allocation3 + $0x18] sm:$0xff]  }
  0x2b   :  { %v2031_v13 = vld [vmem:[#allocation3 + $0x90] sm:$0xff]   ;;  %v2033_v15 = vld [vmem:[#allocation3 + $0x98] sm:$0xff]   ;;  %v2034_v16 = vld [vmem:[#allocation3 + $0x20] sm:$0xff]  }
  0x2c   :  { %1920 = vmatpush3.bf16.msra.mxu0 %v2019_v1  ;;  %2006 = vmatpush3.bf16.msra.mxu1 %v2019_v1  ;;  %v2035_v17 = vld [vmem:[#allocation3 + $0xa0] sm:$0xff]   ;;  %v2036_v18 = vld [vmem:[#allocation3 + $0x28] sm:$0xff]   ;;  %v2038_v20 = vld [vmem:[#allocation3 + $0x30] sm:$0xff]  }
  0x2d   :  { %1921 = vmatprep.subr.bf16.mxu0 %v2020_v2  ;;  %1999 = vmatprep.subr.bf16.mxu1 %v2020_v2  ;;  %v2037_v19 = vld [vmem:[#allocation3 + $0xa8] sm:$0xff]   ;;  %v2039_v21 = vld [vmem:[#allocation3 + $0xb0] sm:$0xff]   ;;  %v2040_v22 = vld [vmem:[#allocation3 + $0x38] sm:$0xff]  }
  0x2e   :  { %v2041_v23 = vld [vmem:[#allocation3 + $0xb8] sm:$0xff]   ;;  %v2042_v24 = vld [vmem:[#allocation3 + $0x40] sm:$0xff]   ;;  %v2044_v26 = vld [vmem:[#allocation3 + $0x48] sm:$0xff]  }
  0x2f   :  { %v2043_v25 = vld [vmem:[#allocation3 + $0xc0] sm:$0xff]   ;;  %v2045_v27 = vld [vmem:[#allocation3 + $0xc8] sm:$0xff]   ;;  %v2046_v28 = vld [vmem:[#allocation3 + $0x50] sm:$0xff]  }
  0x30   :  { %1922 = vmatpush3.bf16.msra.mxu0 %v2020_v2  ;;  %2007 = vmatpush3.bf16.msra.mxu1 %v2020_v2  ;;  %v2047_v29 = vld [vmem:[#allocation3 + $0xd0] sm:$0xff]   ;;  %v2048_v30 = vld [vmem:[#allocation3 + $0x58] sm:$0xff]   ;;  %v2050_v32 = vld [vmem:[#allocation3 + $0x60] sm:$0xff]  }
  0x31   :  { %1923 = vmatprep.subr.bf16.mxu0 %v2021_v3  ;;  %2000 = vmatprep.subr.bf16.mxu1 %v2021_v3  ;;  %v2049_v31 = vld [vmem:[#allocation3 + $0xd8] sm:$0xff]   ;;  %v2051_v33 = vld [vmem:[#allocation3 + $0xe0] sm:$0xff]   ;;  %v2052_v34 = vld [vmem:[#allocation3 + $0x68] sm:$0xff]  }
  0x32   :  { %v2053_v35 = vld [vmem:[#allocation3 + $0xe8] sm:$0xff]   ;;  %v2054_v36 = vld [vmem:[#allocation3 + $0x70] sm:$0xff]   ;;  %v2056_v38 = vld [vmem:[#allocation3 + $0x78] sm:$0xff]  }
  0x33   :  { %v2055_v37 = vld [vmem:[#allocation3 + $0xf0] sm:$0xff]   ;;  %v2057_v39 = vld [vmem:[#allocation3 + $0xf8] sm:$0xff]   ;;  %v2188_v40 = vld [vmem:[%s2271_s2] ss:$0 sm:$0xff]  ;;  %s2134_s2 = smov [#allocation8]  }
  0x34   :  { %1924 = vmatpush3.bf16.msra.mxu0 %v2021_v3  ;;  %2008 = vmatpush3.bf16.msra.mxu1 %v2021_v3  ;;  %s1504_s11 = sshll.u32 %s2134_s2, 4  ;;  %s1505_s11 = int_to_ptr.vmem [resolvable:$true] %s1504_s11 }
  0x35   :  { %1925 = vmatprep.subr.bf16.mxu0 %v2022_v6  ;;  %2001 = vmatprep.subr.bf16.mxu1 %v2022_v6  ;;  %s2102_s12 = scalar_lea.vmem %s1505_s11, 4096  ;;  %p2107_p3 = scmp.lt.s32.totalorder %s1505_s11, %s1505_s11 }
  0x36   :  { %p2103_p2 = scmp.ne.s32.totalorder %s1505_s11, %s2102_s12  ;;  %p2108_p4 = scmp.lt.s32.totalorder %s2102_s12, %s2102_s12 }
  0x38   :  { %1926 = vmatpush3.bf16.msra.mxu0 %v2022_v6  ;;  %2009 = vmatpush3.bf16.msra.mxu1 %v2022_v6  ;;  %p2109_p5 = por %p2108_p4, %p2107_p3 }
  0x39   :  { %1927 = vmatprep.subr.bf16.mxu0 %v2023_v7  ;;  %2002 = vmatprep.subr.bf16.mxu1 %v2023_v7 }
  0x3a   :  { %p2110_p6 = pnand %p2109_p5, %p2103_p2 }
  0x3c   :  { %1928 = vmatpush3.bf16.msra.mxu0 %v2023_v7  ;;  %2010 = vmatpush3.bf16.msra.mxu1 %v2023_v7 }
  0x3d   :  { %1929 = vmatprep.subr.bf16.mxu0 %v2024_v8  ;;  %2003 = vmatprep.subr.bf16.mxu1 %v2024_v8 }
  0x40   :  { %1930 = vmatpush3.bf16.msra.mxu0 %v2024_v8  ;;  %2011 = vmatpush3.bf16.msra.mxu1 %v2024_v8 }
  0x41   :  { %1931 = vmatprep.subr.bf16.mxu0 %v2025_v9  ;;  %2004 = vmatprep.subr.bf16.mxu1 %v2025_v9 }
  0x44   :  { %1932 = vmatpush3.bf16.msra.mxu0 %v2025_v9  ;;  %2012 = vmatpush3.bf16.msra.mxu1 %v2025_v9 }
  0x47   :  { %1934 = vmatmul.mubr.bf16.vlgmr.msra.gmra.mrb[0].mxu0 %v2028_v10  ;;  %1966 = vmatmul.mubr.bf16.vlgmr.msra.gmra.mrb[0].mxu1 %v2029_v11 }
  0x48   :  { %1937 = vmatprep.mubr.bf16.mxu0 %v2030_v12  ;;  %1969 = vmatprep.mubr.bf16.mxu1 %v2031_v13 }
  0x4f   :  { %1938 = vmatmul.mubr.bf16.gmra.mrb[4].mxu0 %v2032_v14  ;;  %1970 = vmatmul.mubr.bf16.gmra.mrb[4].mxu1 %v2033_v15 }
  0x50   :  { %1941 = vmatprep.mubr.bf16.mxu0 %v2034_v16  ;;  %1973 = vmatprep.mubr.bf16.mxu1 %v2035_v17 }
  0x57   :  { %1942 = vmatmul.mubr.bf16.gmra.mrb[8].mxu0 %v2036_v18  ;;  %1974 = vmatmul.mubr.bf16.gmra.mrb[8].mxu1 %v2037_v19 }
  0x58   :  { %1945 = vmatprep.mubr.bf16.mxu0 %v2038_v20  ;;  %1977 = vmatprep.mubr.bf16.mxu1 %v2039_v21 }
  0x5f   :  { %1946 = vmatmul.mubr.bf16.gmra.mrb[12].mxu0 %v2040_v22  ;;  %1978 = vmatmul.mubr.bf16.gmra.mrb[12].mxu1 %v2041_v23 }
  0x60   :  { %1949 = vmatprep.mubr.bf16.mxu0 %v2042_v24  ;;  %1981 = vmatprep.mubr.bf16.mxu1 %v2043_v25 }
  0x67   :  { %1950 = vmatmul.mubr.bf16.gmra.mrb[16].mxu0 %v2044_v26  ;;  %1982 = vmatmul.mubr.bf16.gmra.mrb[16].mxu1 %v2045_v27 }
  0x68   :  { %1953 = vmatprep.mubr.bf16.mxu0 %v2046_v28  ;;  %1985 = vmatprep.mubr.bf16.mxu1 %v2047_v29 }
  0x6f   :  { %1954 = vmatmul.mubr.bf16.gmra.mrb[20].mxu0 %v2048_v30  ;;  %1986 = vmatmul.mubr.bf16.gmra.mrb[20].mxu1 %v2049_v31 }
  0x70   :  { %1957 = vmatprep.mubr.bf16.mxu0 %v2050_v32  ;;  %1989 = vmatprep.mubr.bf16.mxu1 %v2051_v33 }
  0x77   :  { %1958 = vmatmul.mubr.bf16.gmra.mrb[24].mxu0 %v2052_v34  ;;  %1990 = vmatmul.mubr.bf16.gmra.mrb[24].mxu1 %v2053_v35 }
  0x78   :  { %1961 = vmatprep.mubr.bf16.mxu0 %v2054_v36  ;;  %1993 = vmatprep.mubr.bf16.mxu1 %v2055_v37 }
  0x7f   :  { %1962 = vmatmul.mubr.bf16.gmra.mrb[28].mxu0 %v2056_v38  ;;  %1994 = vmatmul.mubr.bf16.gmra.mrb[28].mxu1 %v2057_v39 }
 0x11a   :  { %v1935_v41 = vpop.f32.mrb[0].mxu0  ;;  %v1967_v42 = vpop.f32.mrb[0].mxu1 }
 0x11b   :  { %v989_v43 = vadd.f32 %v1935_v41, %v2188_v40  ;;  %v1021_v44 = vadd.f32 %v1967_v42, %v2188_v40  ;;  %v530_v45 = vpop.f32.mrb[1].mxu0  ;;  %v658_v46 = vpop.f32.mrb[1].mxu1 }
 0x11c   :  { %v987_v47 = vadd.f32 %v2188_v40, %v530_v45  ;;  %v1019_v48 = vadd.f32 %v2188_v40, %v658_v46  ;;  %v1936_v49 = vpop.f32.mrb[2].mxu0  ;;  %v1968_v50 = vpop.f32.mrb[2].mxu1 }
 0x11d   :  { %v1053_v51 = vmax.f32 %v989_v43, 0.0  ;;  %v1085_v52 = vmax.f32 %v1021_v44, 0.0  ;;  %v990_v53 = vadd.f32 %v1936_v49, %v2188_v40  ;;  %v1022_v54 = vadd.f32 %v1968_v50, %v2188_v40  ;;  %v533_v55 = vpop.f32.mrb[3].mxu0  ;;  %v661_v56 = vpop.f32.mrb[3].mxu1 }
 0x11e   :  { %v1051_v57 = vmax.f32 %v987_v47, 0.0  ;;  %v1083_v58 = vmax.f32 %v1019_v48, 0.0  ;;  %v988_v59 = vadd.f32 %v2188_v40, %v533_v55  ;;  %v1020_v60 = vadd.f32 %v2188_v40, %v661_v56 }
 0x11f   :  { %v1054_v61 = vmax.f32 %v990_v53, 0.0  ;;  %v1086_v62 = vmax.f32 %v1022_v54, 0.0  ;;  %v1117_v1 = vmin.f32 %v1053_v51, 6.0  ;;  %v1149_v2 = vmin.f32 %v1085_v52, 6.0 }
 0x120   :  { %v1052_v63 = vmax.f32 %v988_v59, 0.0  ;;  %v1084_v0 = vmax.f32 %v1020_v60, 0.0  ;;  %v1115_v5 = vmin.f32 %v1051_v57, 6.0  ;;  %v1147_v6 = vmin.f32 %v1083_v58, 6.0 }
 0x121   :  { %v1118_v3 = vmin.f32 %v1054_v61, 6.0  ;;  %v1150_v4 = vmin.f32 %v1086_v62, 6.0 }
 0x122   :  { %v1116_v7 = vmin.f32 %v1052_v63, 6.0  ;;  %v1148_v8 = vmin.f32 %v1084_v0, 6.0  ;;  %v1939_v9 = vpop.f32.mrb[4].mxu0  ;;  %v1971_v10 = vpop.f32.mrb[4].mxu1 }
 0x123   :  { %v1694_v11 = vpack.c.bf16 %v1118_v3, %v1117_v1  ;;  %v1774_v12 = vpack.c.bf16 %v1150_v4, %v1149_v2  ;;  %v993_v13 = vadd.f32 %v1939_v9, %v2188_v40  ;;  %v1025_v14 = vadd.f32 %v1971_v10, %v2188_v40  ;;  %v546_v15 = vpop.f32.mrb[5].mxu0  ;;  %v674_v16 = vpop.f32.mrb[5].mxu1 }
 0x124   :  { %v1689_v17 = vpack.c.bf16 %v1116_v7, %v1115_v5  ;;  %v1769_v18 = vpack.c.bf16 %v1148_v8, %v1147_v6  ;;  %v991_v19 = vadd.f32 %v2188_v40, %v546_v15  ;;  %v1023_v20 = vadd.f32 %v2188_v40, %v674_v16  ;;  %v1940_v21 = vpop.f32.mrb[6].mxu0  ;;  %v1972_v22 = vpop.f32.mrb[6].mxu1 }
 0x125   :  { %1846 = vst [vmem:[#allocation8 + $0x8] sm:$0xff] %v1694_v11   ;;  %1862 = vst [vmem:[#allocation8 + $0x88] sm:$0xff] %v1774_v12   ;;  %v1057_v23 = vmax.f32 %v993_v13, 0.0  ;;  %v1089_v24 = vmax.f32 %v1025_v14, 0.0  ;;  %v994_v25 = vadd.f32 %v1940_v21, %v2188_v40  ;;  %v1026_v26 = vadd.f32 %v1972_v22, %v2188_v40  ;;  %v549_v27 = vpop.f32.mrb[7].mxu0  ;;  %v677_v28 = vpop.f32.mrb[7].mxu1 }
 0x126   :  { %1690 = vst [vmem:[#allocation8] sm:$0xff] %v1689_v17   ;;  %1861 = vst [vmem:[#allocation8 + $0x80] sm:$0xff] %v1769_v18   ;;  %v1055_v29 = vmax.f32 %v991_v19, 0.0  ;;  %v1087_v30 = vmax.f32 %v1023_v20, 0.0  ;;  %v992_v31 = vadd.f32 %v2188_v40, %v549_v27  ;;  %v1024_v32 = vadd.f32 %v2188_v40, %v677_v28 }
 0x127   :  { %v1058_v33 = vmax.f32 %v994_v25, 0.0  ;;  %v1090_v34 = vmax.f32 %v1026_v26, 0.0  ;;  %v1121_v37 = vmin.f32 %v1057_v23, 6.0  ;;  %v1153_v38 = vmin.f32 %v1089_v24, 6.0 }
 0x128   :  { %v1056_v35 = vmax.f32 %v992_v31, 0.0  ;;  %v1088_v36 = vmax.f32 %v1024_v32, 0.0  ;;  %v1119_v42 = vmin.f32 %v1055_v29, 6.0  ;;  %v1151_v43 = vmin.f32 %v1087_v30, 6.0 }
 0x129   :  { %v1122_v39 = vmin.f32 %v1058_v33, 6.0  ;;  %v1154_v41 = vmin.f32 %v1090_v34, 6.0 }
 0x12a   :  { %v1120_v44 = vmin.f32 %v1056_v35, 6.0  ;;  %v1152_v45 = vmin.f32 %v1088_v36, 6.0  ;;  %v1943_v46 = vpop.f32.mrb[8].mxu0  ;;  %v1975_v47 = vpop.f32.mrb[8].mxu1 }
 0x12b   :  { %v1704_v48 = vpack.c.bf16 %v1122_v39, %v1121_v37  ;;  %v1784_v49 = vpack.c.bf16 %v1154_v41, %v1153_v38  ;;  %v997_v50 = vadd.f32 %v1943_v46, %v2188_v40  ;;  %v1029_v51 = vadd.f32 %v1975_v47, %v2188_v40  ;;  %v562_v52 = vpop.f32.mrb[9].mxu0  ;;  %v690_v53 = vpop.f32.mrb[9].mxu1 }
 0x12c   :  { %v1699_v54 = vpack.c.bf16 %v1120_v44, %v1119_v42  ;;  %v1779_v55 = vpack.c.bf16 %v1152_v45, %v1151_v43  ;;  %v995_v56 = vadd.f32 %v2188_v40, %v562_v52  ;;  %v1027_v57 = vadd.f32 %v2188_v40, %v690_v53  ;;  %v1944_v58 = vpop.f32.mrb[10].mxu0  ;;  %v1976_v59 = vpop.f32.mrb[10].mxu1 }
 0x12d   :  { %1848 = vst [vmem:[#allocation8 + $0x18] sm:$0xff] %v1704_v48   ;;  %1864 = vst [vmem:[#allocation8 + $0x98] sm:$0xff] %v1784_v49   ;;  %v1061_v60 = vmax.f32 %v997_v50, 0.0  ;;  %v1093_v61 = vmax.f32 %v1029_v51, 0.0  ;;  %v998_v62 = vadd.f32 %v1944_v58, %v2188_v40  ;;  %v1030_v63 = vadd.f32 %v1976_v59, %v2188_v40  ;;  %v565_v0 = vpop.f32.mrb[11].mxu0  ;;  %v693_v1 = vpop.f32.mrb[11].mxu1 }
 0x12e   :  { %1847 = vst [vmem:[#allocation8 + $0x10] sm:$0xff] %v1699_v54   ;;  %1863 = vst [vmem:[#allocation8 + $0x90] sm:$0xff] %v1779_v55   ;;  %v1059_v2 = vmax.f32 %v995_v56, 0.0  ;;  %v1091_v3 = vmax.f32 %v1027_v57, 0.0  ;;  %v996_v4 = vadd.f32 %v2188_v40, %v565_v0  ;;  %v1028_v5 = vadd.f32 %v2188_v40, %v693_v1 }
 0x12f   :  { %v1062_v6 = vmax.f32 %v998_v62, 0.0  ;;  %v1094_v7 = vmax.f32 %v1030_v63, 0.0  ;;  %v1125_v10 = vmin.f32 %v1061_v60, 6.0  ;;  %v1157_v11 = vmin.f32 %v1093_v61, 6.0 }
 0x130   :  { %v1060_v8 = vmax.f32 %v996_v4, 0.0  ;;  %v1092_v9 = vmax.f32 %v1028_v5, 0.0  ;;  %v1123_v14 = vmin.f32 %v1059_v2, 6.0  ;;  %v1155_v15 = vmin.f32 %v1091_v3, 6.0 }
 0x131   :  { %v1126_v12 = vmin.f32 %v1062_v6, 6.0  ;;  %v1158_v13 = vmin.f32 %v1094_v7, 6.0 }
 0x132   :  { %v1124_v16 = vmin.f32 %v1060_v8, 6.0  ;;  %v1156_v17 = vmin.f32 %v1092_v9, 6.0  ;;  %v1947_v18 = vpop.f32.mrb[12].mxu0  ;;  %v1979_v19 = vpop.f32.mrb[12].mxu1 }
 0x133   :  { %v1714_v20 = vpack.c.bf16 %v1126_v12, %v1125_v10  ;;  %v1794_v21 = vpack.c.bf16 %v1158_v13, %v1157_v11  ;;  %v1001_v22 = vadd.f32 %v1947_v18, %v2188_v40  ;;  %v1033_v23 = vadd.f32 %v1979_v19, %v2188_v40  ;;  %v578_v24 = vpop.f32.mrb[13].mxu0  ;;  %v706_v25 = vpop.f32.mrb[13].mxu1 }
 0x134   :  { %v1709_v26 = vpack.c.bf16 %v1124_v16, %v1123_v14  ;;  %v1789_v27 = vpack.c.bf16 %v1156_v17, %v1155_v15  ;;  %v999_v28 = vadd.f32 %v2188_v40, %v578_v24  ;;  %v1031_v29 = vadd.f32 %v2188_v40, %v706_v25  ;;  %v1948_v30 = vpop.f32.mrb[14].mxu0  ;;  %v1980_v31 = vpop.f32.mrb[14].mxu1 }
 0x135   :  { %1850 = vst [vmem:[#allocation8 + $0x28] sm:$0xff] %v1714_v20   ;;  %1866 = vst [vmem:[#allocation8 + $0xa8] sm:$0xff] %v1794_v21   ;;  %v1065_v32 = vmax.f32 %v1001_v22, 0.0  ;;  %v1097_v33 = vmax.f32 %v1033_v23, 0.0  ;;  %v1002_v34 = vadd.f32 %v1948_v30, %v2188_v40  ;;  %v1034_v35 = vadd.f32 %v1980_v31, %v2188_v40  ;;  %v581_v36 = vpop.f32.mrb[15].mxu0  ;;  %v709_v37 = vpop.f32.mrb[15].mxu1 }
 0x136   :  { %1849 = vst [vmem:[#allocation8 + $0x20] sm:$0xff] %v1709_v26   ;;  %1865 = vst [vmem:[#allocation8 + $0xa0] sm:$0xff] %v1789_v27   ;;  %v1063_v38 = vmax.f32 %v999_v28, 0.0  ;;  %v1095_v39 = vmax.f32 %v1031_v29, 0.0  ;;  %v1000_v41 = vadd.f32 %v2188_v40, %v581_v36  ;;  %v1032_v42 = vadd.f32 %v2188_v40, %v709_v37 }
 0x137   :  { %v1066_v43 = vmax.f32 %v1002_v34, 0.0  ;;  %v1098_v44 = vmax.f32 %v1034_v35, 0.0  ;;  %v1129_v47 = vmin.f32 %v1065_v32, 6.0  ;;  %v1161_v48 = vmin.f32 %v1097_v33, 6.0 }
 0x138   :  { %v1064_v45 = vmax.f32 %v1000_v41, 0.0  ;;  %v1096_v46 = vmax.f32 %v1032_v42, 0.0  ;;  %v1127_v51 = vmin.f32 %v1063_v38, 6.0  ;;  %v1159_v52 = vmin.f32 %v1095_v39, 6.0 }
 0x139   :  { %v1130_v49 = vmin.f32 %v1066_v43, 6.0  ;;  %v1162_v50 = vmin.f32 %v1098_v44, 6.0 }
 0x13a   :  { %v1128_v53 = vmin.f32 %v1064_v45, 6.0  ;;  %v1160_v54 = vmin.f32 %v1096_v46, 6.0  ;;  %v1951_v55 = vpop.f32.mrb[16].mxu0  ;;  %v1983_v56 = vpop.f32.mrb[16].mxu1 }
 0x13b   :  { %v1724_v57 = vpack.c.bf16 %v1130_v49, %v1129_v47  ;;  %v1804_v58 = vpack.c.bf16 %v1162_v50, %v1161_v48  ;;  %v1005_v59 = vadd.f32 %v1951_v55, %v2188_v40  ;;  %v1037_v60 = vadd.f32 %v1983_v56, %v2188_v40  ;;  %v594_v61 = vpop.f32.mrb[17].mxu0  ;;  %v722_v62 = vpop.f32.mrb[17].mxu1 }
 0x13c   :  { %v1719_v63 = vpack.c.bf16 %v1128_v53, %v1127_v51  ;;  %v1799_v0 = vpack.c.bf16 %v1160_v54, %v1159_v52  ;;  %v1003_v1 = vadd.f32 %v2188_v40, %v594_v61  ;;  %v1035_v2 = vadd.f32 %v2188_v40, %v722_v62  ;;  %v1952_v3 = vpop.f32.mrb[18].mxu0  ;;  %v1984_v4 = vpop.f32.mrb[18].mxu1 }
 0x13d   :  { %1852 = vst [vmem:[#allocation8 + $0x38] sm:$0xff] %v1724_v57   ;;  %1868 = vst [vmem:[#allocation8 + $0xb8] sm:$0xff] %v1804_v58   ;;  %v1069_v5 = vmax.f32 %v1005_v59, 0.0  ;;  %v1101_v6 = vmax.f32 %v1037_v60, 0.0  ;;  %v1006_v7 = vadd.f32 %v1952_v3, %v2188_v40  ;;  %v1038_v8 = vadd.f32 %v1984_v4, %v2188_v40  ;;  %v597_v9 = vpop.f32.mrb[19].mxu0  ;;  %v725_v10 = vpop.f32.mrb[19].mxu1 }
 0x13e   :  { %1851 = vst [vmem:[#allocation8 + $0x30] sm:$0xff] %v1719_v63   ;;  %1867 = vst [vmem:[#allocation8 + $0xb0] sm:$0xff] %v1799_v0   ;;  %v1067_v11 = vmax.f32 %v1003_v1, 0.0  ;;  %v1099_v12 = vmax.f32 %v1035_v2, 0.0  ;;  %v1004_v13 = vadd.f32 %v2188_v40, %v597_v9  ;;  %v1036_v14 = vadd.f32 %v2188_v40, %v725_v10 }
 0x13f   :  { %v1070_v15 = vmax.f32 %v1006_v7, 0.0  ;;  %v1102_v16 = vmax.f32 %v1038_v8, 0.0  ;;  %v1133_v19 = vmin.f32 %v1069_v5, 6.0  ;;  %v1165_v20 = vmin.f32 %v1101_v6, 6.0 }
 0x140   :  { %v1068_v17 = vmax.f32 %v1004_v13, 0.0  ;;  %v1100_v18 = vmax.f32 %v1036_v14, 0.0  ;;  %v1131_v23 = vmin.f32 %v1067_v11, 6.0  ;;  %v1163_v24 = vmin.f32 %v1099_v12, 6.0 }
 0x141   :  { %v1134_v21 = vmin.f32 %v1070_v15, 6.0  ;;  %v1166_v22 = vmin.f32 %v1102_v16, 6.0 }
 0x142   :  { %v1132_v25 = vmin.f32 %v1068_v17, 6.0  ;;  %v1164_v26 = vmin.f32 %v1100_v18, 6.0  ;;  %v1955_v27 = vpop.f32.mrb[20].mxu0  ;;  %v1987_v28 = vpop.f32.mrb[20].mxu1 }
 0x143   :  { %v1734_v29 = vpack.c.bf16 %v1134_v21, %v1133_v19  ;;  %v1814_v30 = vpack.c.bf16 %v1166_v22, %v1165_v20  ;;  %v1009_v31 = vadd.f32 %v1955_v27, %v2188_v40  ;;  %v1041_v32 = vadd.f32 %v1987_v28, %v2188_v40  ;;  %v610_v33 = vpop.f32.mrb[21].mxu0  ;;  %v738_v34 = vpop.f32.mrb[21].mxu1 }
 0x144   :  { %v1729_v35 = vpack.c.bf16 %v1132_v25, %v1131_v23  ;;  %v1809_v36 = vpack.c.bf16 %v1164_v26, %v1163_v24  ;;  %v1007_v37 = vadd.f32 %v2188_v40, %v610_v33  ;;  %v1039_v38 = vadd.f32 %v2188_v40, %v738_v34  ;;  %v1956_v39 = vpop.f32.mrb[22].mxu0  ;;  %v1988_v41 = vpop.f32.mrb[22].mxu1 }
 0x145   :  { %1854 = vst [vmem:[#allocation8 + $0x48] sm:$0xff] %v1734_v29   ;;  %1870 = vst [vmem:[#allocation8 + $0xc8] sm:$0xff] %v1814_v30   ;;  %v1073_v42 = vmax.f32 %v1009_v31, 0.0  ;;  %v1105_v43 = vmax.f32 %v1041_v32, 0.0  ;;  %v1010_v44 = vadd.f32 %v1956_v39, %v2188_v40  ;;  %v1042_v45 = vadd.f32 %v1988_v41, %v2188_v40  ;;  %v613_v46 = vpop.f32.mrb[23].mxu0  ;;  %v741_v47 = vpop.f32.mrb[23].mxu1 }
 0x146   :  { %1853 = vst [vmem:[#allocation8 + $0x40] sm:$0xff] %v1729_v35   ;;  %1869 = vst [vmem:[#allocation8 + $0xc0] sm:$0xff] %v1809_v36   ;;  %v1071_v48 = vmax.f32 %v1007_v37, 0.0  ;;  %v1103_v49 = vmax.f32 %v1039_v38, 0.0  ;;  %v1008_v50 = vadd.f32 %v2188_v40, %v613_v46  ;;  %v1040_v51 = vadd.f32 %v2188_v40, %v741_v47 }
 0x147   :  { %v1074_v52 = vmax.f32 %v1010_v44, 0.0  ;;  %v1106_v53 = vmax.f32 %v1042_v45, 0.0  ;;  %v1137_v56 = vmin.f32 %v1073_v42, 6.0  ;;  %v1169_v57 = vmin.f32 %v1105_v43, 6.0 }
 0x148   :  { %v1072_v54 = vmax.f32 %v1008_v50, 0.0  ;;  %v1104_v55 = vmax.f32 %v1040_v51, 0.0  ;;  %v1135_v60 = vmin.f32 %v1071_v48, 6.0  ;;  %v1167_v61 = vmin.f32 %v1103_v49, 6.0 }
 0x149   :  { %v1138_v58 = vmin.f32 %v1074_v52, 6.0  ;;  %v1170_v59 = vmin.f32 %v1106_v53, 6.0 }
 0x14a   :  { %v1136_v62 = vmin.f32 %v1072_v54, 6.0  ;;  %v1168_v63 = vmin.f32 %v1104_v55, 6.0  ;;  %v1959_v0 = vpop.f32.mrb[24].mxu0  ;;  %v1991_v1 = vpop.f32.mrb[24].mxu1 }
 0x14b   :  { %v1744_v2 = vpack.c.bf16 %v1138_v58, %v1137_v56  ;;  %v1824_v3 = vpack.c.bf16 %v1170_v59, %v1169_v57  ;;  %v1013_v4 = vadd.f32 %v1959_v0, %v2188_v40  ;;  %v1045_v5 = vadd.f32 %v1991_v1, %v2188_v40  ;;  %v626_v6 = vpop.f32.mrb[25].mxu0  ;;  %v754_v7 = vpop.f32.mrb[25].mxu1 }
 0x14c   :  { %v1739_v8 = vpack.c.bf16 %v1136_v62, %v1135_v60  ;;  %v1819_v9 = vpack.c.bf16 %v1168_v63, %v1167_v61  ;;  %v1011_v10 = vadd.f32 %v2188_v40, %v626_v6  ;;  %v1043_v11 = vadd.f32 %v2188_v40, %v754_v7  ;;  %v1960_v12 = vpop.f32.mrb[26].mxu0  ;;  %v1992_v13 = vpop.f32.mrb[26].mxu1 }
 0x14d   :  { %1856 = vst [vmem:[#allocation8 + $0x58] sm:$0xff] %v1744_v2   ;;  %1872 = vst [vmem:[#allocation8 + $0xd8] sm:$0xff] %v1824_v3   ;;  %v1077_v14 = vmax.f32 %v1013_v4, 0.0  ;;  %v1109_v15 = vmax.f32 %v1045_v5, 0.0  ;;  %v1014_v16 = vadd.f32 %v1960_v12, %v2188_v40  ;;  %v1046_v17 = vadd.f32 %v1992_v13, %v2188_v40  ;;  %v629_v18 = vpop.f32.mrb[27].mxu0  ;;  %v757_v19 = vpop.f32.mrb[27].mxu1 }
 0x14e   :  { %1855 = vst [vmem:[#allocation8 + $0x50] sm:$0xff] %v1739_v8   ;;  %1871 = vst [vmem:[#allocation8 + $0xd0] sm:$0xff] %v1819_v9   ;;  %v1075_v20 = vmax.f32 %v1011_v10, 0.0  ;;  %v1107_v21 = vmax.f32 %v1043_v11, 0.0  ;;  %v1012_v22 = vadd.f32 %v2188_v40, %v629_v18  ;;  %v1044_v23 = vadd.f32 %v2188_v40, %v757_v19 }
 0x14f   :  { %v1078_v24 = vmax.f32 %v1014_v16, 0.0  ;;  %v1110_v25 = vmax.f32 %v1046_v17, 0.0  ;;  %v1141_v28 = vmin.f32 %v1077_v14, 6.0  ;;  %v1173_v29 = vmin.f32 %v1109_v15, 6.0 }
 0x150   :  { %v1076_v26 = vmax.f32 %v1012_v22, 0.0  ;;  %v1108_v27 = vmax.f32 %v1044_v23, 0.0  ;;  %v1139_v32 = vmin.f32 %v1075_v20, 6.0  ;;  %v1171_v33 = vmin.f32 %v1107_v21, 6.0 }
 0x151   :  { %v1142_v30 = vmin.f32 %v1078_v24, 6.0  ;;  %v1174_v31 = vmin.f32 %v1110_v25, 6.0 }
 0x152   :  { %v1140_v34 = vmin.f32 %v1076_v26, 6.0  ;;  %v1172_v35 = vmin.f32 %v1108_v27, 6.0  ;;  %v1963_v36 = vpop.f32.mrb[28].mxu0  ;;  %v1995_v37 = vpop.f32.mrb[28].mxu1 }
 0x153   :  { %v1754_v38 = vpack.c.bf16 %v1142_v30, %v1141_v28  ;;  %v1834_v39 = vpack.c.bf16 %v1174_v31, %v1173_v29  ;;  %v1017_v41 = vadd.f32 %v1963_v36, %v2188_v40  ;;  %v1049_v42 = vadd.f32 %v1995_v37, %v2188_v40  ;;  %v642_v43 = vpop.f32.mrb[29].mxu0  ;;  %v770_v44 = vpop.f32.mrb[29].mxu1 }
 0x154   :  { %v1749_v45 = vpack.c.bf16 %v1140_v34, %v1139_v32  ;;  %v1829_v46 = vpack.c.bf16 %v1172_v35, %v1171_v33  ;;  %v1015_v47 = vadd.f32 %v2188_v40, %v642_v43  ;;  %v1047_v48 = vadd.f32 %v2188_v40, %v770_v44  ;;  %v1964_v49 = vpop.f32.mrb[30].mxu0  ;;  %v1996_v50 = vpop.f32.mrb[30].mxu1 }
 0x155   :  { %1858 = vst [vmem:[#allocation8 + $0x68] sm:$0xff] %v1754_v38   ;;  %1874 = vst [vmem:[#allocation8 + $0xe8] sm:$0xff] %v1834_v39   ;;  %v1081_v51 = vmax.f32 %v1017_v41, 0.0  ;;  %v1113_v52 = vmax.f32 %v1049_v42, 0.0  ;;  %v1018_v53 = vadd.f32 %v1964_v49, %v2188_v40  ;;  %v1050_v54 = vadd.f32 %v1996_v50, %v2188_v40  ;;  %v645_v55 = vpop.f32.mrb[31].mxu0  ;;  %v773_v56 = vpop.f32.mrb[31].mxu1 }
 0x156   :  { %1857 = vst [vmem:[#allocation8 + $0x60] sm:$0xff] %v1749_v45   ;;  %1873 = vst [vmem:[#allocation8 + $0xe0] sm:$0xff] %v1829_v46   ;;  %v1079_v57 = vmax.f32 %v1015_v47, 0.0  ;;  %v1111_v58 = vmax.f32 %v1047_v48, 0.0  ;;  %v1016_v59 = vadd.f32 %v2188_v40, %v645_v55  ;;  %v1048_v60 = vadd.f32 %v2188_v40, %v773_v56 }
 0x157   :  { %v1082_v61 = vmax.f32 %v1018_v53, 0.0  ;;  %v1114_v62 = vmax.f32 %v1050_v54, 0.0  ;;  %v1145_v1 = vmin.f32 %v1081_v51, 6.0  ;;  %v1177_v2 = vmin.f32 %v1113_v52, 6.0 }
 0x158   :  { %v1080_v63 = vmax.f32 %v1016_v59, 0.0  ;;  %v1112_v0 = vmax.f32 %v1048_v60, 0.0  ;;  %v1143_v5 = vmin.f32 %v1079_v57, 6.0  ;;  %v1175_v6 = vmin.f32 %v1111_v58, 6.0 }
 0x159   :  { %v1146_v3 = vmin.f32 %v1082_v61, 6.0  ;;  %v1178_v4 = vmin.f32 %v1114_v62, 6.0 }
 0x15a   :  { %v1144_v7 = vmin.f32 %v1080_v63, 6.0  ;;  %v1176_v8 = vmin.f32 %v1112_v0, 6.0 }
 0x15b   :  { %v1764_v9 = vpack.c.bf16 %v1146_v3, %v1145_v1  ;;  %v1844_v10 = vpack.c.bf16 %v1178_v4, %v1177_v2 }
 0x15c   :  { %v1759_v11 = vpack.c.bf16 %v1144_v7, %v1143_v5  ;;  %v1839_v12 = vpack.c.bf16 %v1176_v8, %v1175_v6 }
 0x15d   :  { %1860 = vst [vmem:[#allocation8 + $0x78] sm:$0xff] %v1764_v9   ;;  %1876 = vst [vmem:[#allocation8 + $0xf8] sm:$0xff] %v1844_v10  }
 0x15e   :  { %1859 = vst [vmem:[#allocation8 + $0x70] sm:$0xff] %v1759_v11   ;;  %1875 = vst [vmem:[#allocation8 + $0xf0] sm:$0xff] %v1839_v12  }
 0x15f   :  { %2113 = shalt.err (!%p2110_p6)
}
 0x160   :  { %s2114_s15 = scalar_lea.hbm %s2272_s3, 4096 }
 0x161   :  { %p2115_p7 = scmp.ne.s32.totalorder %s2272_s3, %s2114_s15  ;;  %p2118_p8 = scmp.lt.u32.totalorder %s2114_s15, %s2272_s3 }
 0x163   :  { %p2120_p9 = pnand %p2118_p8, %p2115_p7 }
 0x165   :  { %2123 = shalt.err (!%p2120_p9)
}
 0x166   :  { %1510 = dma.vmem_to_hbm [thread:$0]  %s1505_s11, 4096, %s2272_s3, [#allocation5], %s2131_s22, %s2131_s22, %s2132_s23  }
 0x167   :  { %2128 = dma.done.wait [#allocation5], 4096  }
 0x168   :  { %2129 = vsyncadd [#allocation5], 4294963200 }
 0x169   :  { %1514 = vsyncpa [#allocation4], 1 }
 0x16a   :  { %1515 = vsyncpa [#allocation7], 1 }
 0x16b   :  { %1516 = vsyncpa [#allocation5], 1 }

</bundles_post_ra>
